<compile_context>
chip_gen: v7x
topology: tpu7x:2x2x1
jax: 0.10.0
libtpu: 0.0.40
codegen_flags: <defaults>
</compile_context>

<pallas_src>
import jax
import jax.numpy as jnp
from jax.experimental import pallas as pl
from jax.experimental.pallas import tpu as pltpu


def _add_softmax_kernel(x1_ref, x2_ref, o_ref):
    # x1_ref, x2_ref, o_ref: (TR, D) tiles; softmax over the last (lane) axis.
    s = x1_ref[...].astype(jnp.float32) + x2_ref[...].astype(jnp.float32)
    m = jnp.max(s, axis=-1, keepdims=True)            # XLU cross-lane reduce
    e = jnp.exp(s - m)                                 # EUP
    l = jnp.sum(e, axis=-1, keepdims=True)             # XLU cross-lane reduce
    o_ref[...] = (e * pl.reciprocal(l, approx=False)).astype(o_ref.dtype)


def add_softmax(x1, x2):
    """softmax(x1 + x2, axis=-1) — functional equivalent of torch_ipex add_softmax_.

    x2 may be broadcastable against x1 (e.g. an attention mask).
    Returns an array with x1's shape and dtype.
    """
    if x2.shape != x1.shape:
        x2 = jnp.broadcast_to(x2, x1.shape)
    x2 = x2.astype(x1.dtype)

    orig_shape = x1.shape
    D = orig_shape[-1]
    R = x1.size // D

    # Fold every leading dim into rows: contiguous reshape, no data movement.
    x1f = x1.reshape(R, D)
    x2f = x2.reshape(R, D)

    # Row tile: one full-array block for small inputs (single grid step);
    # 512-row tiles with a "parallel" grid axis once R gets large.
    if R <= 1024:
        TR = max(8, ((R + 7) // 8) * 8)        # sublane-aligned, single block
    else:
        TR = 512
    Rp = ((R + TR - 1) // TR) * TR
    if Rp != R:
        # Rows are independent under row-wise softmax, so zero-padding extra
        # rows is harmless; they are sliced off below.
        x1f = jnp.pad(x1f, ((0, Rp - R), (0, 0)))
        x2f = jnp.pad(x2f, ((0, Rp - R), (0, 0)))

    out = pl.pallas_call(
        _add_softmax_kernel,
        out_shape=jax.ShapeDtypeStruct((Rp, D), x1.dtype),
        grid_spec=pltpu.PrefetchScalarGridSpec(
            num_scalar_prefetch=0,
            grid=(Rp // TR,),
            in_specs=[
                pl.BlockSpec((TR, D), lambda i: (i, 0)),
                pl.BlockSpec((TR, D), lambda i: (i, 0)),
            ],
            out_specs=pl.BlockSpec((TR, D), lambda i: (i, 0)),
        ),
        compiler_params=pltpu.CompilerParams(
            dimension_semantics=("parallel",)),
    )(x1f, x2f)

    if Rp != R:
        out = out[:R]
    return out.reshape(orig_shape)


if __name__ == "__main__":
    # Typical add_softmax_ usage: attention scores + additive mask,
    # shape (batch, heads, seq, seq) = (2, 4, 16, 16).
    B, H, S = 2, 4, 16
    key = jax.random.PRNGKey(0)
    k1, k2 = jax.random.split(key)
    x1 = jax.random.normal(k1, (B, H, S, S), dtype=jnp.float32)
    x2 = jax.random.normal(k2, (B, H, S, S), dtype=jnp.float32)

    out = add_softmax(x1, x2)
    out = jax.block_until_ready(out)

    # TODO(synk): torch_ipex.add_softmax_ mutates x1 in place; JAX is
    # functional, so this wrapper returns a new array with identical values.
    ref = jax.nn.softmax(x1 + x2, axis=-1)

    assert out.shape == x1.shape, out.shape
    assert jnp.allclose(out, ref, rtol=1e-5, atol=1e-5), float(
        jnp.max(jnp.abs(out - ref)))

    print("KERNEL_OK")
</pallas_src>

<mosaic_0001>
module attributes {stable_mosaic.version = 11 : i64} {
  func.func @_add_softmax_kernel(%arg0: i32, %arg1: memref<128x16xf32, #tpu.memory_space<vmem>>, %arg2: memref<128x16xf32, #tpu.memory_space<vmem>>, %arg3: memref<128x16xf32, #tpu.memory_space<vmem>>) attributes {dimension_semantics = [#tpu.dimension_semantics<parallel>], iteration_bounds = array<i64: 1>, scalar_prefetch = 0 : i64, scratch_operands = 0 : i64, tpu.core_type = #tpu.core_type<tc>, window_params = [{transform_indices = @transform_0, window_bounds = array<i64: 128, 16>}, {transform_indices = @transform_1, window_bounds = array<i64: 128, 16>}, {transform_indices = @transform_2, window_bounds = array<i64: 128, 16>}]} {
    %c0 = arith.constant 0 : index
    %c0_0 = arith.constant 0 : index
    %0 = vector.load %arg1[%c0, %c0_0] : memref<128x16xf32, #tpu.memory_space<vmem>>, vector<128x16xf32>
    %c0_1 = arith.constant 0 : index
    %c0_2 = arith.constant 0 : index
    %1 = vector.load %arg2[%c0_1, %c0_2] : memref<128x16xf32, #tpu.memory_space<vmem>>, vector<128x16xf32>
    %2 = arith.addf %0, %1 : vector<128x16xf32>
    %cst = arith.constant dense<0xFF800000> : vector<128xf32>
    %3 = vector.multi_reduction <maximumf>, %2, %cst [1] : vector<128x16xf32> to vector<128xf32>
    %4 = vector.shape_cast %3 : vector<128xf32> to vector<128x1xf32>
    %5 = vector.broadcast %4 : vector<128x1xf32> to vector<128x16xf32>
    %6 = arith.subf %2, %5 : vector<128x16xf32>
    %7 = math.exp %6 : vector<128x16xf32>
    %cst_3 = arith.constant dense<0.000000e+00> : vector<128xf32>
    %8 = vector.multi_reduction <add>, %7, %cst_3 [1] : vector<128x16xf32> to vector<128xf32>
    %9 = vector.shape_cast %8 : vector<128xf32> to vector<128x1xf32>
    %10 = tpu.reciprocal %9 : vector<128x1xf32> -> vector<128x1xf32>
    %11 = vector.broadcast %10 : vector<128x1xf32> to vector<128x16xf32>
    %12 = arith.mulf %7, %11 : vector<128x16xf32>
    %c0_4 = arith.constant 0 : index
    %c0_5 = arith.constant 0 : index
    %13 = vector.load %arg3[%c0_4, %c0_5] : memref<128x16xf32, #tpu.memory_space<vmem>>, vector<128x16xf32>
    tpu.vector_store %arg3[%c0_4, %c0_5], %12 {strides = array<i32>} : memref<128x16xf32, #tpu.memory_space<vmem>>, vector<128x16xf32>,
    return
  }
  func.func @transform_0(%arg0: i32) -> (i32, i32) {
    %c0_i32 = arith.constant 0 : i32
    %c0_i32_0 = arith.constant 0 : i32
    return %arg0, %c0_i32 : i32, i32
  }
  func.func @transform_1(%arg0: i32) -> (i32, i32) {
    %c0_i32 = arith.constant 0 : i32
    %c0_i32_0 = arith.constant 0 : i32
    return %arg0, %c0_i32 : i32, i32
  }
  func.func @transform_2(%arg0: i32) -> (i32, i32) {
    %c0_i32 = arith.constant 0 : i32
    %c0_i32_0 = arith.constant 0 : i32
    return %arg0, %c0_i32 : i32, i32
  }
}

</mosaic_0001>

<bundles_post_ra>
// kernel: tpu_custom_call.1
= control target key start
LH: loop header
LB: loop body
LE: loop exit
PB: predicated region body
PF: predicated region fallthrough
CT: control target
= control target key end

     0   :  { %vm59_vm0 = vcmask 130048   ;;  %s655_s0 = inlined_call_operand.vmem [shape: f32[128,16], index: 0, kind: input, shape index: {}]   ;;  %s656_s1 = inlined_call_operand.vmem [shape: f32[128,16], index: 1, kind: input, shape index: {}]   ;;  %s657_s2 = inlined_call_operand.vmem [shape: f32[128,16], index: 2, kind: output, shape index: {}]  }
   0x1   :  { %v11_v0 = vld [vmem:[%s655_s0] sm:$0xff]  ;;  %v13_v2 = vld [vmem:[%s655_s0 + $0x10] sm:$0xff]  ;;  %v12_v5 = vld [vmem:[%s655_s0 + $0x8] sm:$0xff] }
   0x2   :  { %v27_v1 = vld [vmem:[%s656_s1] sm:$0xff]  ;;  %v29_v4 = vld [vmem:[%s656_s1 + $0x10] sm:$0xff]  ;;  %v28_v6 = vld [vmem:[%s656_s1 + $0x8] sm:$0xff] }
   0x3   :  { %v344_v3 = vadd.f32 %v27_v1, %v11_v0  ;;  %v355_v7 = vadd.f32 %v29_v4, %v13_v2  ;;  %v357_v8 = vadd.f32 %v28_v6, %v12_v5  ;;  %v14_v9 = vld [vmem:[%s655_s0 + $0x18] sm:$0xff]  ;;  %v15_v11 = vld [vmem:[%s655_s0 + $0x20] sm:$0xff]  ;;  %v16_v15 = vld [vmem:[%s655_s0 + $0x28] sm:$0xff] }
   0x4   :  { %v30_v10 = vld [vmem:[%s656_s1 + $0x18] sm:$0xff]  ;;  %v31_v14 = vld [vmem:[%s656_s1 + $0x20] sm:$0xff]  ;;  %v32_v16 = vld [vmem:[%s656_s1 + $0x28] sm:$0xff] }
   0x5   :  { %v60_v12 = vsel %vm59_vm0, %v344_v3, -inf  ;;  %v370_v13 = vadd.f32 %v30_v10, %v14_v9  ;;  %v66_v17 = vsel %vm59_vm0, %v355_v7, -inf  ;;  %v63_v18 = vsel %vm59_vm0, %v357_v8, -inf  ;;  %v17_v22 = vld [vmem:[%s655_s0 + $0x30] sm:$0xff]  ;;  %v18_v24 = vld [vmem:[%s655_s0 + $0x38] sm:$0xff]  ;;  %v19_v30 = vld [vmem:[%s655_s0 + $0x40] sm:$0xff] }
   0x6   :  { %61 = vmax.xlane.f32.xlu0 %v60_v12  ;;  %67 = vmax.xlane.f32.xlu1 %v66_v17  ;;  %v385_v19 = vadd.f32 %v31_v14, %v15_v11  ;;  %v389_v21 = vadd.f32 %v32_v16, %v16_v15  ;;  %v33_v23 = vld [vmem:[%s656_s1 + $0x30] sm:$0xff]  ;;  %v34_v25 = vld [vmem:[%s656_s1 + $0x38] sm:$0xff]  ;;  %v35_v31 = vld [vmem:[%s656_s1 + $0x40] sm:$0xff] }
   0x7   :  { %v69_v20 = vsel %vm59_vm0, %v370_v13, -inf  ;;  %v405_v27 = vadd.f32 %v33_v23, %v17_v22  ;;  %v409_v29 = vadd.f32 %v34_v25, %v18_v24  ;;  %v20_v32 = vld [vmem:[%s655_s0 + $0x48] sm:$0xff]  ;;  %v425_v35 = vadd.f32 %v35_v31, %v19_v30  ;;  %v21_v38 = vld [vmem:[%s655_s0 + $0x50] sm:$0xff]  ;;  %v22_v40 = vld [vmem:[%s655_s0 + $0x58] sm:$0xff] }
   0x8   :  { %v72_v26 = vsel %vm59_vm0, %v385_v19, -inf  ;;  %v75_v28 = vsel %vm59_vm0, %v389_v21, -inf  ;;  %v36_v33 = vld [vmem:[%s656_s1 + $0x48] sm:$0xff]  ;;  %v37_v39 = vld [vmem:[%s656_s1 + $0x50] sm:$0xff]  ;;  %v38_v41 = vld [vmem:[%s656_s1 + $0x58] sm:$0xff] }
   0x9   :  { %v78_v34 = vsel %vm59_vm0, %v405_v27, -inf  ;;  %v81_v36 = vsel %vm59_vm0, %v409_v29, -inf  ;;  %v429_v37 = vadd.f32 %v36_v33, %v20_v32  ;;  %v84_v42 = vsel %vm59_vm0, %v425_v35, -inf  ;;  %v23_v46 = vld [vmem:[%s655_s0 + $0x60] sm:$0xff]  ;;  %v24_v48 = vld [vmem:[%s655_s0 + $0x68] sm:$0xff]  ;;  %v25_v54 = vld [vmem:[%s655_s0 + $0x70] sm:$0xff] }
   0xa   :  { %64 = vmax.xlane.f32.xlu0 %v63_v18  ;;  %70 = vmax.xlane.f32.xlu1 %v69_v20  ;;  %v445_v43 = vadd.f32 %v37_v39, %v21_v38  ;;  %v449_v45 = vadd.f32 %v38_v41, %v22_v40  ;;  %v39_v47 = vld [vmem:[%s656_s1 + $0x60] sm:$0xff]  ;;  %v40_v49 = vld [vmem:[%s656_s1 + $0x68] sm:$0xff]  ;;  %v41_v55 = vld [vmem:[%s656_s1 + $0x70] sm:$0xff] }
   0xb   :  { %v87_v44 = vsel %vm59_vm0, %v429_v37, -inf  ;;  %v465_v51 = vadd.f32 %v39_v47, %v23_v46  ;;  %v469_v53 = vadd.f32 %v40_v49, %v24_v48  ;;  %v26_v56 = vld [vmem:[%s655_s0 + $0x78] sm:$0xff]  ;;  %v485_v59 = vadd.f32 %v41_v55, %v25_v54 }
   0xc   :  { %v90_v50 = vsel %vm59_vm0, %v445_v43, -inf  ;;  %v93_v52 = vsel %vm59_vm0, %v449_v45, -inf  ;;  %v42_v57 = vld [vmem:[%s656_s1 + $0x78] sm:$0xff] }
   0xd   :  { %v96_v58 = vsel %vm59_vm0, %v465_v51, -inf  ;;  %v99_v60 = vsel %vm59_vm0, %v469_v53, -inf  ;;  %v489_v61 = vadd.f32 %v42_v57, %v26_v56  ;;  %v102_v62 = vsel %vm59_vm0, %v485_v59, -inf }
   0xe   :  { %73 = vmax.xlane.f32.xlu0 %v72_v26  ;;  %76 = vmax.xlane.f32.xlu1 %v75_v28 }
   0xf   :  { %v105_v63 = vsel %vm59_vm0, %v489_v61, -inf }
  0x12   :  { %79 = vmax.xlane.f32.xlu0 %v78_v34  ;;  %82 = vmax.xlane.f32.xlu1 %v81_v36 }
  0x16   :  { %85 = vmax.xlane.f32.xlu0 %v84_v42  ;;  %88 = vmax.xlane.f32.xlu1 %v87_v44 }
  0x1a   :  { %91 = vmax.xlane.f32.xlu0 %v90_v50  ;;  %94 = vmax.xlane.f32.xlu1 %v93_v52 }
  0x1e   :  { %97 = vmax.xlane.f32.xlu0 %v96_v58  ;;  %100 = vmax.xlane.f32.xlu1 %v99_v60 }
  0x22   :  { %103 = vmax.xlane.f32.xlu0 %v102_v62  ;;  %106 = vmax.xlane.f32.xlu1 %v105_v63 }
  0x93   :  { %v62_v0 = vpop.xlane.xlu0 %61  ;;  %v68_v2 = vpop.xlane.xlu1 %67 }
  0x94   :  { %v108_v1 = vsub.f32 %v344_v3, %v62_v0  ;;  %v110_v4 = vsub.f32 %v355_v7, %v68_v2 }
  0x96   :  { %v124_v5 = vmul.f32 1.442695, %v108_v1  ;;  %v128_v6 = vmul.f32 1.442695, %v110_v4 }
  0x97   :  { %v65_v9 = vpop.xlane.xlu0 %64  ;;  %v71_v11 = vpop.xlane.xlu1 %70 }
  0x98   :  { %256 = vpow2.f32 %v124_v5  ;;  %v109_v10 = vsub.f32 %v357_v8, %v65_v9  ;;  %v111_v12 = vsub.f32 %v370_v13, %v71_v11 }
  0x99   :  { %258 = vpow2.f32 %v128_v6 }
  0x9a   :  { %v126_v14 = vmul.f32 1.442695, %v109_v10  ;;  %v130_v15 = vmul.f32 1.442695, %v111_v12 }
  0x9b   :  { %v74_v16 = vpop.xlane.xlu0 %73  ;;  %v77_v3 = vpop.xlane.xlu1 %76 }
  0x9c   :  { %260 = vpow2.f32 %v126_v14  ;;  %v112_v17 = vsub.f32 %v385_v19, %v74_v16  ;;  %v113_v7 = vsub.f32 %v389_v21, %v77_v3 }
  0x9d   :  { %262 = vpow2.f32 %v130_v15 }
  0x9e   :  { %v132_v18 = vmul.f32 1.442695, %v112_v17  ;;  %v134_v20 = vmul.f32 1.442695, %v113_v7 }
  0x9f   :  { %v80_v22 = vpop.xlane.xlu0 %79  ;;  %v83_v23 = vpop.xlane.xlu1 %82 }
  0xa0   :  { %264 = vpow2.f32 %v132_v18  ;;  %v114_v8 = vsub.f32 %v405_v27, %v80_v22  ;;  %v115_v13 = vsub.f32 %v409_v29, %v83_v23 }
  0xa1   :  { %266 = vpow2.f32 %v134_v20 }
  0xa2   :  { %v503_v24 = vpop.eup %256  ;;  %v136_v25 = vmul.f32 1.442695, %v114_v8  ;;  %v138_v19 = vmul.f32 1.442695, %v115_v13 }
  0xa3   :  { %v505_v26 = vpop.eup %258  ;;  %v86_v28 = vpop.xlane.xlu0 %85  ;;  %v156_v21 = vsel %vm59_vm0, %v503_v24, 0.0 }
  0xa4   :  { %268 = vpow2.f32 %v136_v25  ;;  %v116_v30 = vsub.f32 %v425_v35, %v86_v28  ;;  %157 = vadd.xlane.f32.xlu0 %v156_v21  ;;  %v89_v31 = vpop.xlane.xlu1 %88  ;;  %v162_v29 = vsel %vm59_vm0, %v505_v26, 0.0 }
  0xa5   :  { %270 = vpow2.f32 %v138_v19  ;;  %v117_v27 = vsub.f32 %v429_v37, %v89_v31 }
  0xa6   :  { %v513_v32 = vpop.eup %260  ;;  %v140_v33 = vmul.f32 1.442695, %v116_v30 }
  0xa7   :  { %v515_v34 = vpop.eup %262  ;;  %v142_v36 = vmul.f32 1.442695, %v117_v27  ;;  %v92_v38 = vpop.xlane.xlu0 %91  ;;  %v159_v39 = vsel %vm59_vm0, %v513_v32, 0.0 }
  0xa8   :  { %272 = vpow2.f32 %v140_v33  ;;  %v118_v35 = vsub.f32 %v445_v43, %v92_v38  ;;  %163 = vadd.xlane.f32.xlu0 %v162_v29  ;;  %160 = vadd.xlane.f32.xlu1 %v159_v39  ;;  %v95_v40 = vpop.xlane.xlu1 %94  ;;  %v165_v41 = vsel %vm59_vm0, %v515_v34, 0.0 }
  0xa9   :  { %274 = vpow2.f32 %v142_v36  ;;  %v119_v37 = vsub.f32 %v449_v45, %v95_v40 }
  0xaa   :  { %v523_v42 = vpop.eup %264  ;;  %v144_v44 = vmul.f32 1.442695, %v118_v35 }
  0xab   :  { %v525_v46 = vpop.eup %266  ;;  %v146_v47 = vmul.f32 1.442695, %v119_v37  ;;  %v98_v48 = vpop.xlane.xlu0 %97  ;;  %v168_v49 = vsel %vm59_vm0, %v523_v42, 0.0 }
  0xac   :  { %276 = vpow2.f32 %v144_v44  ;;  %v120_v43 = vsub.f32 %v465_v51, %v98_v48  ;;  %166 = vadd.xlane.f32.xlu1 %v165_v41  ;;  %169 = vadd.xlane.f32.xlu0 %v168_v49  ;;  %v101_v50 = vpop.xlane.xlu1 %100  ;;  %v171_v52 = vsel %vm59_vm0, %v525_v46, 0.0 }
  0xad   :  { %278 = vpow2.f32 %v146_v47  ;;  %v121_v45 = vsub.f32 %v469_v53, %v101_v50 }
  0xae   :  { %v533_v54 = vpop.eup %268  ;;  %v148_v55 = vmul.f32 1.442695, %v120_v43 }
  0xaf   :  { %v535_v56 = vpop.eup %270  ;;  %v150_v57 = vmul.f32 1.442695, %v121_v45  ;;  %v104_v58 = vpop.xlane.xlu0 %103  ;;  %v174_v60 = vsel %vm59_vm0, %v533_v54, 0.0 }
  0xb0   :  { %280 = vpow2.f32 %v148_v55  ;;  %v122_v51 = vsub.f32 %v485_v59, %v104_v58  ;;  %172 = vadd.xlane.f32.xlu1 %v171_v52  ;;  %175 = vadd.xlane.f32.xlu0 %v174_v60  ;;  %v107_v62 = vpop.xlane.xlu1 %106  ;;  %v177_v63 = vsel %vm59_vm0, %v535_v56, 0.0 }
  0xb1   :  { %282 = vpow2.f32 %v150_v57  ;;  %v123_v53 = vsub.f32 %v489_v61, %v107_v62 }
  0xb2   :  { %v543_v0 = vpop.eup %272  ;;  %v152_v1 = vmul.f32 1.442695, %v122_v51 }
  0xb3   :  { %v545_v2 = vpop.eup %274  ;;  %v154_v4 = vmul.f32 1.442695, %v123_v53  ;;  %v180_v5 = vsel %vm59_vm0, %v543_v0, 0.0 }
  0xb4   :  { %284 = vpow2.f32 %v152_v1  ;;  %178 = vadd.xlane.f32.xlu1 %v177_v63  ;;  %181 = vadd.xlane.f32.xlu0 %v180_v5  ;;  %v183_v59 = vsel %vm59_vm0, %v545_v2, 0.0 }
  0xb5   :  { %286 = vpow2.f32 %v154_v4 }
  0xb6   :  { %v551_v61 = vpop.eup %276 }
  0xb7   :  { %v553_v6 = vpop.eup %278  ;;  %v186_v9 = vsel %vm59_vm0, %v551_v61, 0.0 }
  0xb8   :  { %184 = vadd.xlane.f32.xlu1 %v183_v59  ;;  %187 = vadd.xlane.f32.xlu0 %v186_v9  ;;  %v189_v10 = vsel %vm59_vm0, %v553_v6, 0.0 }
  0xba   :  { %v559_v11 = vpop.eup %280 }
  0xbb   :  { %v561_v12 = vpop.eup %282  ;;  %v192_v14 = vsel %vm59_vm0, %v559_v11, 0.0 }
  0xbc   :  { %190 = vadd.xlane.f32.xlu1 %v189_v10  ;;  %193 = vadd.xlane.f32.xlu0 %v192_v14  ;;  %v195_v15 = vsel %vm59_vm0, %v561_v12, 0.0 }
  0xbe   :  { %v567_v16 = vpop.eup %284 }
  0xbf   :  { %v569_v17 = vpop.eup %286  ;;  %v198_v3 = vsel %vm59_vm0, %v567_v16, 0.0 }
  0xc0   :  { %196 = vadd.xlane.f32.xlu1 %v195_v15  ;;  %199 = vadd.xlane.f32.xlu0 %v198_v3  ;;  %v201_v7 = vsel %vm59_vm0, %v569_v17, 0.0 }
  0xc4   :  { %202 = vadd.xlane.f32.xlu1 %v201_v7 }
 0x131   :  { %v158_v18 = vpop.xlane.xlu0 %157 }
 0x132   :  { %288 = vrcp.f32 %v158_v18 }
 0x135   :  { %v161_v20 = vpop.xlane.xlu1 %160  ;;  %v164_v22 = vpop.xlane.xlu0 %163 }
 0x136   :  { %290 = vrcp.f32 %v161_v20 }
 0x137   :  { %292 = vrcp.f32 %v164_v22 }
 0x139   :  { %v167_v8 = vpop.xlane.xlu1 %166  ;;  %v170_v23 = vpop.xlane.xlu0 %169 }
 0x13a   :  { %294 = vrcp.f32 %v167_v8 }
 0x13b   :  { %296 = vrcp.f32 %v170_v23 }
 0x13c   :  { %v289_v13 = vpop.eup %288 }
 0x13d   :  { %v220_v25 = vmul.f32 %v289_v13, %v503_v24  ;;  %v173_v19 = vpop.xlane.xlu1 %172  ;;  %v176_v28 = vpop.xlane.xlu0 %175 }
 0x13e   :  { %298 = vrcp.f32 %v173_v19 }
 0x13f   :  { %236 = vst.msk [vmem:[%s657_s2] sm:$0xff] %vm59_vm0, %v220_v25  ;;  %300 = vrcp.f32 %v176_v28 }
 0x140   :  { %v291_v21 = vpop.eup %290 }
 0x141   :  { %v293_v30 = vpop.eup %292  ;;  %v221_v31 = vmul.f32 %v291_v21, %v513_v32  ;;  %v179_v27 = vpop.xlane.xlu1 %178 }
 0x142   :  { %v182_v29 = vpop.xlane.xlu0 %181  ;;  %v222_v33 = vmul.f32 %v293_v30, %v505_v26  ;;  %302 = vrcp.f32 %v179_v27 }
 0x143   :  { %237 = vst.msk [vmem:[%s657_s2 + $0x8] sm:$0xff] %vm59_vm0, %v221_v31  ;;  %304 = vrcp.f32 %v182_v29 }
 0x144   :  { %v295_v24 = vpop.eup %294  ;;  %238 = vst.msk [vmem:[%s657_s2 + $0x10] sm:$0xff] %vm59_vm0, %v222_v33 }
 0x145   :  { %v297_v36 = vpop.eup %296  ;;  %v223_v32 = vmul.f32 %v295_v24, %v515_v34  ;;  %v185_v38 = vpop.xlane.xlu1 %184 }
 0x146   :  { %v188_v39 = vpop.xlane.xlu0 %187  ;;  %v224_v26 = vmul.f32 %v297_v36, %v523_v42  ;;  %306 = vrcp.f32 %v185_v38 }
 0x147   :  { %239 = vst.msk [vmem:[%s657_s2 + $0x18] sm:$0xff] %vm59_vm0, %v223_v32  ;;  %308 = vrcp.f32 %v188_v39 }
 0x148   :  { %v299_v35 = vpop.eup %298  ;;  %240 = vst.msk [vmem:[%s657_s2 + $0x20] sm:$0xff] %vm59_vm0, %v224_v26 }
 0x149   :  { %v301_v40 = vpop.eup %300  ;;  %v225_v34 = vmul.f32 %v299_v35, %v525_v46  ;;  %v191_v37 = vpop.xlane.xlu1 %190 }
 0x14a   :  { %v194_v41 = vpop.xlane.xlu0 %193  ;;  %v226_v42 = vmul.f32 %v301_v40, %v533_v54  ;;  %310 = vrcp.f32 %v191_v37 }
 0x14b   :  { %241 = vst.msk [vmem:[%s657_s2 + $0x28] sm:$0xff] %vm59_vm0, %v225_v34  ;;  %312 = vrcp.f32 %v194_v41 }
 0x14c   :  { %v303_v44 = vpop.eup %302  ;;  %242 = vst.msk [vmem:[%s657_s2 + $0x30] sm:$0xff] %vm59_vm0, %v226_v42 }
 0x14d   :  { %v305_v47 = vpop.eup %304  ;;  %v227_v46 = vmul.f32 %v303_v44, %v535_v56  ;;  %v197_v48 = vpop.xlane.xlu1 %196 }
 0x14e   :  { %v200_v49 = vpop.xlane.xlu0 %199  ;;  %v228_v43 = vmul.f32 %v305_v47, %v543_v0  ;;  %314 = vrcp.f32 %v197_v48 }
 0x14f   :  { %243 = vst.msk [vmem:[%s657_s2 + $0x38] sm:$0xff] %vm59_vm0, %v227_v46  ;;  %316 = vrcp.f32 %v200_v49 }
 0x150   :  { %v307_v50 = vpop.eup %306  ;;  %244 = vst.msk [vmem:[%s657_s2 + $0x40] sm:$0xff] %vm59_vm0, %v228_v43 }
 0x151   :  { %v309_v45 = vpop.eup %308  ;;  %v229_v52 = vmul.f32 %v307_v50, %v545_v2  ;;  %v203_v54 = vpop.xlane.xlu1 %202 }
 0x152   :  { %v230_v55 = vmul.f32 %v309_v45, %v551_v61  ;;  %318 = vrcp.f32 %v203_v54 }
 0x153   :  { %245 = vst.msk [vmem:[%s657_s2 + $0x48] sm:$0xff] %vm59_vm0, %v229_v52 }
 0x154   :  { %v311_v56 = vpop.eup %310  ;;  %246 = vst.msk [vmem:[%s657_s2 + $0x50] sm:$0xff] %vm59_vm0, %v230_v55 }
 0x155   :  { %v313_v57 = vpop.eup %312  ;;  %v231_v58 = vmul.f32 %v311_v56, %v553_v6 }
 0x156   :  { %v232_v60 = vmul.f32 %v313_v57, %v559_v11 }
 0x157   :  { %247 = vst.msk [vmem:[%s657_s2 + $0x58] sm:$0xff] %vm59_vm0, %v231_v58 }
 0x158   :  { %v315_v51 = vpop.eup %314  ;;  %248 = vst.msk [vmem:[%s657_s2 + $0x60] sm:$0xff] %vm59_vm0, %v232_v60 }
 0x159   :  { %v317_v62 = vpop.eup %316  ;;  %v233_v53 = vmul.f32 %v315_v51, %v561_v12 }
 0x15a   :  { %v234_v63 = vmul.f32 %v317_v62, %v567_v16 }
 0x15b   :  { %249 = vst.msk [vmem:[%s657_s2 + $0x68] sm:$0xff] %vm59_vm0, %v233_v53 }
 0x15c   :  { %v319_v0 = vpop.eup %318  ;;  %250 = vst.msk [vmem:[%s657_s2 + $0x70] sm:$0xff] %vm59_vm0, %v234_v63 }
 0x15d   :  { %v235_v1 = vmul.f32 %v319_v0, %v569_v17 }
 0x15f   :  { %251 = vst.msk [vmem:[%s657_s2 + $0x78] sm:$0xff] %vm59_vm0, %v235_v1 }

</bundles_post_ra>
